<compile_context>
chip_gen: v7x
topology: tpu7x:2x2x1
jax: 0.10.0
libtpu: 0.0.40
codegen_flags: <defaults>
</compile_context>

<pallas_src>
import functools
import math
from typing import Iterable

import numpy as np

import jax
import jax.numpy as jnp
from jax.experimental import pallas as pl
from jax.experimental.pallas import tpu as pltpu

_LANE = 128
_BF16_SUBLANE = 16  # bf16 native tiling is (16, 128)


def _round_up(x, m):
    return (x + m - 1) // m * m


def _pick_tile(total, candidates, cap=None):
    for c in candidates:
        if total % c == 0 and (cap is None or c <= cap):
            return c
    return _LANE  # unreachable: total is a multiple of 128 and 128 is a candidate


@functools.lru_cache(maxsize=16)
def _build_rotation_matrix_t(H, W, angle_deg):
    """Dense (HW, HW) float32 numpy matrix MT such that
    (img.reshape(-1) @ MT).reshape(H, W) is `img` rotated counter-clockwise by
    `angle_deg` about the image centre (bilinear interpolation, zero fill).
    Stands in for the undefined custom op torch.ops.my_ops.rotate.
    Built directly in transposed (src, out) layout, host-side (numpy)."""
    theta = math.radians(float(angle_deg))
    c, s = math.cos(theta), math.sin(theta)
    cy, cx = (H - 1) / 2.0, (W - 1) / 2.0
    ii, jj = np.meshgrid(np.arange(H, dtype=np.float64),
                         np.arange(W, dtype=np.float64), indexing="ij")
    dy, dx = ii - cy, jj - cx
    # inverse mapping: source-image location sampled by each output pixel
    sx = c * dx + s * dy + cx
    sy = -s * dx + c * dy + cy
    x0, y0 = np.floor(sx), np.floor(sy)

    HW = H * W
    out_idx = (ii * W + jj).astype(np.int64).reshape(-1)
    MT = np.zeros((HW, HW), np.float64)
    for oy in (0, 1):
        for ox in (0, 1):
            xs_, ys_ = x0 + ox, y0 + oy
            wgt = (1.0 - np.abs(sx - xs_)) * (1.0 - np.abs(sy - ys_))
            valid = (xs_ >= 0) & (xs_ <= W - 1) & (ys_ >= 0) & (ys_ <= H - 1)
            wgt = np.where(valid, wgt, 0.0).reshape(-1)
            src = (np.clip(ys_, 0, H - 1).astype(np.int64) * W
                   + np.clip(xs_, 0, W - 1).astype(np.int64)).reshape(-1)
            np.add.at(MT, (src, out_idx), wgt)
    return MT.astype(np.float32)


@functools.lru_cache(maxsize=16)
def _packed_rotation_tiles(H, W, angle_deg, tk, tp):
    """Pack only the nonzero (tk, tp) K-tiles of M^T (band sparsity).

    Returns numpy arrays:
      packed : (P, tk, tp) f32  -- contiguous nonzero tiles (one DMA burst each)
      pidx   : (J, maxK)   i32  -- packed-tile index for grid step (j, k)
      src_kt : (J, maxK)   i32  -- source K-tile index (for slicing VMEM x)
      counts : (J,)        i32  -- number of valid (non-padded) K-tiles per j
    Padded slots repeat the last valid entry so the pipeline skips the re-DMA;
    the kernel gates the matmul with k < counts[j]."""
    MT = _build_rotation_matrix_t(H, W, angle_deg)
    HW = H * W
    hw_pad = _round_up(HW, _LANE)
    if hw_pad != HW:
        MT = np.pad(MT, ((0, hw_pad - HW), (0, hw_pad - HW)))
    nK, J = hw_pad // tk, hw_pad // tp
    blocks = MT.reshape(nK, tk, J, tp)
    nz = np.abs(blocks).sum(axis=(1, 3)) > 0           # (nK, J)
    counts = nz.sum(axis=0).astype(np.int32)           # (J,)
    maxK = max(int(counts.max()), 1)

    pidx = np.zeros((J, maxK), np.int32)
    src_kt = np.zeros((J, maxK), np.int32)
    tiles = []
    for j in range(J):
        ks = np.flatnonzero(nz[:, j])
        for slot, kt in enumerate(ks):
            pidx[j, slot] = len(tiles)
            src_kt[j, slot] = int(kt)
            tiles.append(blocks[kt, :, j, :])
        last_p = pidx[j, len(ks) - 1] if len(ks) else 0
        last_k = src_kt[j, len(ks) - 1] if len(ks) else 0
        for slot in range(len(ks), maxK):
            pidx[j, slot] = last_p
            src_kt[j, slot] = last_k
    if not tiles:  # degenerate (all-zero matrix) -- keep index 0 valid
        tiles.append(np.zeros((tk, tp), np.float32))
    packed = np.ascontiguousarray(np.stack(tiles, axis=0), dtype=np.float32)
    return packed, pidx, src_kt, counts


def _rotate_matmul_kernel(pidx_ref, counts_ref, src_kt_ref,
                          x_ref, mt_ref, o_ref, *, tk):
    # pidx_ref   : (J, maxK) i32 SMEM -- packed-tile table (drives mt index_map)
    # counts_ref : (J,)      i32 SMEM -- valid K-tiles for this output tile j
    # src_kt_ref : (J, maxK) i32 SMEM -- source K-tile index into resident x
    # x_ref      : (S_pad, HW_pad) bf16 -- VMEM-resident flattened channels
    # mt_ref     : (1, tk, TP) bf16    -- one nonzero K-tile of M^T
    # o_ref      : (S_pad, TP) f32     -- output column tile (revisited over k)
    j = pl.program_id(0)
    k = pl.program_id(1)

    @pl.when(k == 0)
    def _():
        o_ref[...] = jnp.zeros_like(o_ref)

    @pl.when(k < counts_ref[j])
    def _():
        start = pl.multiple_of(src_kt_ref[j, k] * tk, tk)
        xk = x_ref[:, pl.ds(start, tk)]
        o_ref[...] += jnp.dot(xk, mt_ref[0],
                              preferred_element_type=jnp.float32)


def rotate(x, params, indices: Iterable[int]):
    """Pallas equivalent of Rotate.forward(x, params, indices)."""
    try:
        angle = float(params[0])
    except Exception:
        raise ValueError("Rotation parameter should be a float")
    assert 0 <= angle <= 360, "Rotation parameter should be between 0 and 360 degrees"
    assert x.ndim == 4 and x.shape[0] == 1, "reference module assumes batch size 1"

    _, C, H, W = x.shape
    sel = sorted({int(i) for i in indices if 0 <= int(i) < C})
    if not sel:
        return x

    S = len(sel)
    HW = H * W
    HW_pad = _round_up(HW, _LANE)
    S_pad = _round_up(S, _BF16_SUBLANE)          # bf16 LHS: (16, 128) native tile

    # >=2 blocks on the parallel j axis whenever possible (v7x megacore).
    tp_cap = max(_LANE, HW_pad // 2)
    TP = _pick_tile(HW_pad, (1024, 512, 256, 128), cap=tp_cap)   # lane-dense output tile
    TK = _pick_tile(HW_pad, (4096, 2048, 1024, 512, 256, 128))   # reduction tile

    packed_np, pidx_np, src_kt_np, counts_np = _packed_rotation_tiles(
        H, W, angle, TK, TP)

    mt_packed = jnp.asarray(packed_np).astype(jnp.bfloat16)   # (P, TK, TP)
    pidx = jnp.asarray(pidx_np)
    src_kt = jnp.asarray(src_kt_np)
    counts = jnp.asarray(counts_np)

    sel_arr = jnp.asarray(sel, dtype=jnp.int32)
    xs = x[0, sel_arr].reshape(S, HW).astype(jnp.bfloat16)
    xs = jnp.pad(xs, ((0, S_pad - S), (0, HW_pad - HW)))        # (S_pad, HW_pad)

    J = HW_pad // TP
    maxK = pidx_np.shape[1]

    kernel = functools.partial(_rotate_matmul_kernel, tk=TK)

    ys = pl.pallas_call(
        kernel,
        out_shape=jax.ShapeDtypeStruct((S_pad, HW_pad), jnp.float32),
        grid_spec=pltpu.PrefetchScalarGridSpec(
            num_scalar_prefetch=3,
            grid=(J, maxK),
            in_specs=[
                # x: fully VMEM-resident, constant block index -> single DMA
                pl.BlockSpec((S_pad, HW_pad),
                             lambda j, k, pidx, cnt, skt: (0, 0)),
                # M^T: stream only nonzero K-tiles, chosen by the prefetch table
                pl.BlockSpec((1, TK, TP),
                             lambda j, k, pidx, cnt, skt: (pidx[j, k], 0, 0)),
            ],
            out_specs=pl.BlockSpec((S_pad, TP),
                                   lambda j, k, pidx, cnt, skt: (0, j)),
        ),
        compiler_params=pltpu.CompilerParams(
            dimension_semantics=("parallel", "arbitrary"),
            vmem_limit_bytes=40 * 1024 * 1024,
        ),
    )(pidx, counts, src_kt, xs, mt_packed)

    ys = ys[:S, :HW].astype(x.dtype).reshape(S, H, W)
    # scatter rotated channels back; unselected channels pass through bit-exact
    return x.at[0, sel_arr].set(ys)


if __name__ == "__main__":
    key = jax.random.PRNGKey(0)

    # --- main case: N=1 (reference module assumes batch size 1), C=4, 16x16 ---
    N, C, H, W = 1, 4, 16, 16
    x = jax.random.normal(key, (N, C, H, W), dtype=jnp.float32)
    params = [30.0]
    indices = [0, 2]

    out = jax.block_until_ready(rotate(x, params, indices))

    MT_ref = jnp.asarray(_build_rotation_matrix_t(H, W, float(params[0])))
    sel_arr = jnp.asarray(indices, dtype=jnp.int32)
    S = len(indices)
    ref_sel = (x[0, sel_arr].reshape(S, -1) @ MT_ref).reshape(S, H, W)
    ref = x.at[0, sel_arr].set(ref_sel)

    assert out.shape == x.shape and out.dtype == x.dtype
    # kernel runs bf16 operands on the MXU (f32 accumulation) -> relaxed tolerance
    assert jnp.allclose(out, ref, atol=5e-2, rtol=5e-2)

    # --- padded case: HW not a multiple of 128 exercises the pad/slice path ---
    H2, W2 = 10, 12
    x2 = jax.random.normal(jax.random.PRNGKey(1), (1, 3, H2, W2), dtype=jnp.float32)
    out2 = jax.block_until_ready(rotate(x2, [75.0], [1]))
    MT2 = jnp.asarray(_build_rotation_matrix_t(H2, W2, 75.0))
    ref2_sel = (x2[0, 1].reshape(1, -1) @ MT2).reshape(1, H2, W2)
    ref2 = x2.at[0, jnp.asarray([1])].set(ref2_sel)
    assert out2.shape == x2.shape and out2.dtype == x2.dtype
    assert jnp.allclose(out2, ref2, atol=5e-2, rtol=5e-2)

    print("KERNEL_OK")
</pallas_src>

<mosaic_0001>
module attributes {stable_mosaic.version = 11 : i64} {
  func.func @_rotate_matmul_kernel(%arg0: i32, %arg1: i32, %arg2: memref<2x1xi32, #tpu.memory_space<smem>>, %arg3: memref<2xi32, #tpu.memory_space<smem>>, %arg4: memref<2x1xi32, #tpu.memory_space<smem>>, %arg5: memref<16x256xbf16, #tpu.memory_space<vmem>>, %arg6: memref<1x256x128xbf16, #tpu.memory_space<vmem>>, %arg7: memref<16x128xf32, #tpu.memory_space<vmem>>) attributes {dimension_semantics = [#tpu.dimension_semantics<parallel>, #tpu.dimension_semantics<arbitrary>], iteration_bounds = array<i64: 2, 1>, scalar_prefetch = 3 : i64, scratch_operands = 0 : i64, tpu.core_type = #tpu.core_type<tc>, window_params = [{pipeline_mode = #tpu.pipeline_mode<synchronous>, transform_indices = @transform_0, window_bounds = array<i64: 16, 256>}, {transform_indices = @transform_1, window_bounds = array<i64: 1, 256, 128>}, {transform_indices = @transform_2, window_bounds = array<i64: 16, 128>}]} {
    %c0_i32 = arith.constant 0 : i32
    %0 = arith.cmpi eq, %arg1, %c0_i32 : i32
    %1 = arith.extui %0 : i1 to i32
    %c0_i32_0 = arith.constant 0 : i32
    %2 = arith.cmpi ne, %1, %c0_i32_0 : i32
    scf.if %2 {
      %cst = arith.constant 0.000000e+00 : f32
      %8 = vector.broadcast %cst : f32 to vector<16x128xf32>
      %c0 = arith.constant 0 : index
      %c0_2 = arith.constant 0 : index
      %9 = vector.load %arg7[%c0, %c0_2] : memref<16x128xf32, #tpu.memory_space<vmem>>, vector<16x128xf32>
      tpu.vector_store %arg7[%c0, %c0_2], %8 {strides = array<i32>} : memref<16x128xf32, #tpu.memory_space<vmem>>, vector<16x128xf32>,
    } else {
    }
    %3 = arith.index_cast %arg0 : i32 to index
    %4 = memref.load %arg3[%3] : memref<2xi32, #tpu.memory_space<smem>>
    %5 = arith.cmpi slt, %arg1, %4 : i32
    %6 = arith.extui %5 : i1 to i32
    %c0_i32_1 = arith.constant 0 : i32
    %7 = arith.cmpi ne, %6, %c0_i32_1 : i32
    scf.if %7 {
      %8 = arith.index_cast %arg0 : i32 to index
      %9 = arith.index_cast %arg1 : i32 to index
      %10 = memref.load %arg4[%8, %9] : memref<2x1xi32, #tpu.memory_space<smem>>
      %c256_i32 = arith.constant 256 : i32
      %11 = arith.muli %10, %c256_i32 : i32
      %12 = tpu.assume_multiple %11, 256 : i32
      %c0 = arith.constant 0 : index
      %13 = arith.index_cast %12 : i32 to index
      %14 = vector.load %arg5[%c0, %13] : memref<16x256xbf16, #tpu.memory_space<vmem>>, vector<16x256xbf16>
      %c0_2 = arith.constant 0 : index
      %c0_3 = arith.constant 0 : index
      %15 = vector.load %arg7[%c0_2, %c0_3] : memref<16x128xf32, #tpu.memory_space<vmem>>, vector<16x128xf32>
      %c0_4 = arith.constant 0 : index
      %c0_5 = arith.constant 0 : index
      %c0_6 = arith.constant 0 : index
      %16 = vector.load %arg6[%c0_4, %c0_5, %c0_6] : memref<1x256x128xbf16, #tpu.memory_space<vmem>>, vector<1x256x128xbf16>
      %17 = vector.shape_cast %16 : vector<1x256x128xbf16> to vector<256x128xbf16>
      %cst = arith.constant dense<0.000000e+00> : vector<16x128xf32>
      %18 = tpu.matmul %14, %17, %cst {dimension_numbers = #tpu.dot_dimension_numbers<[1], [0], [0], [1], [0, 0, 1, 1], [], []>} : vector<16x256xbf16>, vector<256x128xbf16>, vector<16x128xf32> -> vector<16x128xf32>
      %19 = arith.addf %15, %18 : vector<16x128xf32>
      %c0_7 = arith.constant 0 : index
      %c0_8 = arith.constant 0 : index
      %20 = vector.load %arg7[%c0_7, %c0_8] : memref<16x128xf32, #tpu.memory_space<vmem>>, vector<16x128xf32>
      tpu.vector_store %arg7[%c0_7, %c0_8], %19 {strides = array<i32>} : memref<16x128xf32, #tpu.memory_space<vmem>>, vector<16x128xf32>,
    } else {
    }
    return
  }
  func.func @transform_0(%arg0: i32, %arg1: i32, %arg2: memref<2x1xi32, #tpu.memory_space<smem>>, %arg3: memref<2xi32, #tpu.memory_space<smem>>, %arg4: memref<2x1xi32, #tpu.memory_space<smem>>) -> (i32, i32) {
    %c0_i32 = arith.constant 0 : i32
    %c0_i32_0 = arith.constant 0 : i32
    %c0_i32_1 = arith.constant 0 : i32
    return %c0_i32, %c0_i32_0 : i32, i32
  }
  func.func @transform_1(%arg0: i32, %arg1: i32, %arg2: memref<2x1xi32, #tpu.memory_space<smem>>, %arg3: memref<2xi32, #tpu.memory_space<smem>>, %arg4: memref<2x1xi32, #tpu.memory_space<smem>>) -> (i32, i32, i32) {
    %0 = arith.index_cast %arg0 : i32 to index
    %1 = arith.index_cast %arg1 : i32 to index
    %2 = memref.load %arg2[%0, %1] : memref<2x1xi32, #tpu.memory_space<smem>>
    %c0_i32 = arith.constant 0 : i32
    %c0_i32_0 = arith.constant 0 : i32
    %c0_i32_1 = arith.constant 0 : i32
    return %2, %c0_i32, %c0_i32_0 : i32, i32, i32
  }
  func.func @transform_2(%arg0: i32, %arg1: i32, %arg2: memref<2x1xi32, #tpu.memory_space<smem>>, %arg3: memref<2xi32, #tpu.memory_space<smem>>, %arg4: memref<2x1xi32, #tpu.memory_space<smem>>) -> (i32, i32) {
    %c0_i32 = arith.constant 0 : i32
    %c0_i32_0 = arith.constant 0 : i32
    return %c0_i32, %arg0 : i32, i32
  }
}

</mosaic_0001>

<bundles_post_ra>
// kernel: tpu_custom_call.1
= control target key start
LH: loop header
LB: loop body
LE: loop exit
PB: predicated region body
PF: predicated region fallthrough
CT: control target
= control target key end

     0   :  { %s1188_s0 = inlined_call_operand.vmem [shape: s32[2,1], index: 0, kind: input, shape index: {}]   ;;  %s1189_s3 = inlined_call_operand.vmem [shape: bf16[16,256], index: 3, kind: input, shape index: {}]   ;;  %s1190_s4 = inlined_call_operand.hbm [shape: bf16[2,256,128], index: 4, kind: input, shape index: {}]   ;;  %s1191_s5 = inlined_call_operand.hbm [shape: f32[16,256], index: 5, kind: output, shape index: {}]   ;;  %s1192_s1 = inlined_call_operand.vmem [shape: s32[2], index: 1, kind: input, shape index: {}]   ;;  %s1193_s2 = inlined_call_operand.vmem [shape: s32[2,1], index: 2, kind: input, shape index: {}]  }
   0x1   :  { %s10_s20 = sshll.u32 %s1188_s0, 4  ;;  %s14_s23 = sshll.u32 %s1192_s1, 4  ;;  %s11_s20 = int_to_ptr.vmem [resolvable:$true] %s10_s20  ;;  %s15_s23 = int_to_ptr.vmem [resolvable:$true] %s14_s23 }
   0x2   :  { %s712_s24 = scalar_lea.vmem %s11_s20, 32  ;;  %p717_p1 = scmp.lt.s32.totalorder %s11_s20, %s11_s20 }
   0x3   :  { %p713_p0 = scmp.ne.s32.totalorder %s11_s20, %s712_s24  ;;  %p718_p2 = scmp.lt.s32.totalorder %s712_s24, %s712_s24 }
   0x5   :  { %p719_p3 = por %p718_p2, %p717_p1 }
   0x7   :  { %p720_p4 = pnand %p719_p3, %p713_p0 }
   0x9   :  { %723 = shalt.err (!%p720_p4)  }
   0xa   :  { %s888_s25 = smov [#allocation3]   ;;  %s724_s26 = scalar_lea.vmem %s15_s23, 16 }
   0xb   :  { %13 = dma.vmem_to_smem %s11_s20, 32, %s888_s25, [#allocation2] }
   0xc   :  { %p725_p5 = scmp.ne.s32.totalorder %s15_s23, %s724_s26  ;;  %p729_p6 = scmp.lt.s32.totalorder %s15_s23, %s15_s23 }
   0xd   :  { %p730_p7 = scmp.lt.s32.totalorder %s724_s26, %s724_s26 }
   0xf   :  { %p731_p8 = por %p730_p7, %p729_p6 }
  0x11   :  { %p732_p9 = pnand %p731_p8, %p725_p5 }
  0x13   :  { %735 = shalt.err (!%p732_p9)  }
  0x14   :  { %s889_s0 = smov [#allocation4]   ;;  %s18_s28 = sshll.u32 %s1193_s2, 4  ;;  %s19_s28 = int_to_ptr.vmem [resolvable:$true] %s18_s28 }
  0x15   :  { %17 = dma.vmem_to_smem %s15_s23, 16, %s889_s0, [#allocation2] }
  0x16   :  { %s736_s29 = scalar_lea.vmem %s19_s28, 32  ;;  %p741_p11 = scmp.lt.s32.totalorder %s19_s28, %s19_s28 }
  0x17   :  { %p737_p10 = scmp.ne.s32.totalorder %s19_s28, %s736_s29  ;;  %p742_p12 = scmp.lt.s32.totalorder %s736_s29, %s736_s29 }
  0x19   :  { %p743_p13 = por %p742_p12, %p741_p11 }
  0x1b   :  { %p744_p0 = pnand %p743_p13, %p737_p10 }
  0x1d   :  { %747 = shalt.err (!%p744_p0)  }
  0x1e   :  { %s890_s30 = smov [#allocation5]  }
  0x1f   :  { %21 = dma.vmem_to_smem %s19_s28, 32, %s890_s30, [#allocation2] }
  0x20   :  { %842 = dma.done.wait [#allocation2], 80 }
  0x21   :  { %843 = vsyncadd [#allocation2], 4294967216 }
  0x22   :  { %23 = sfence }
  0x23   :  { %24 = vsyncpa [#allocation7], 0 }
  0x24   :  { %26 = vsyncpa [#allocation7 + $0x1], 0 }
  0x25   :  { %27 = vsyncpa [#allocation8], 0 }
  0x26   :  { %29 = vsyncpa [#allocation8 + $0x1], 0  ;;  %s938_s6 = smov 0   ;;  %s940_s2 = smov 0  }
  0x27   :  { %s942_s7 = smov 0   ;;  %s944_s8 = smov 0  }
  0x28   :  { %s946_s9 = smov 0   ;;  %s948_s10 = smov 0  }
  0x29   :  { %s950_s11 = smov 0   ;;  %s952_s12 = smov 0  }
  0x2a   :  { %s954_s13 = smov 0  }
  0x2b LB: > { %s531_s14 = sadd.s32 4294967295, %s886_s13   ;;  %s532_s15 = sadd.s32 4294967294, %s886_s13   ;;  %s886_s13 = sphi %s954_s13, %s35_s13   ;;  %s882_s12 = sphi %s952_s12, %s1213_s12   ;;  %s878_s11 = sphi %s950_s11, %s1212_s11   ;;  %s874_s10 = sphi %s948_s10, %s1211_s10   ;;  %s870_s9 = sphi %s946_s9, %s1210_s9   ;;  %s866_s8 = sphi %s944_s8, %s1209_s8   ;;  %s862_s7 = sphi %s942_s7, %s1208_s7   ;;  %s858_s2 = sphi %s940_s2, %s1207_s2   ;;  %s854_s6 = sphi %s938_s6, %s1206_s6  }
  0x2c   : > { %s47_s16 = sadd.s32 1, %s882_s12  ;;  %s533_s17 = sshll.u32 %s882_s12, 7 }
  0x2d   : > { %p49_p1 = scmp.ge.s32.totalorder %s47_s16, 2  ;;  %s79_s18 = sld [smem:[#allocation3 + %s533_s17]] }
  0x2e   : > { %s91_s19 = sadd.s32 1, %s874_s10  ;;  %p98_p2 = scmp.ne.s32.totalorder %s874_s10, %s870_s9 }
  0x2f   : > { %s1215_s16 = smov (%p49_p1, %s47_s16), 0  ;;  %p99_p3 = scmp.eq.s32.totalorder %s886_s13, 0 }
  0x30   : > { %p104_p4 = scmp.ne.s32.totalorder %s870_s9, %s866_s8  ;;  %s534_s20 = sshll.u32 %s1215_s16, 7 }
  0x31   : > { %p105_p5 = scmp.eq.s32.totalorder %s531_s14, 0  ;;  %s87_s21 = sld [smem:[#allocation3 + %s534_s20]] }
  0x32   : > { %p995_p6 = por %p99_p3, %p98_p2  ;;  %s114_s24 = ssub.s32 %s882_s12, %s1215_s16 }
  0x33   : > { %p999_p7 = por %p105_p5, %p104_p4  ;;  %p115_p8 = scmp.eq.s32.totalorder %s114_s24, 0 }
  0x34   : > { %s117_s25 = sadd.s32 1, %s862_s7  ;;  %p127_p9 = scmp.ne.s32.totalorder %s862_s7, %s858_s2 }
  0x35   : > { %s1197_s23 = scalar_select %p999_p7, 1, 0 }
  0x36   : > { %p128_p10 = scmp.eq.s32.totalorder %s531_s14, 1  ;;  %p133_p12 = scmp.ne.s32.totalorder %s858_s2, %s854_s6 }
  0x37   : > { %s1009_s26 = scalar_select %p115_p8, %s862_s7, %s117_s25  }
  0x38   : > { %p1011_p11 = por %p128_p10, %p127_p9  ;;  %s88_s1 = ssub.s32 %s79_s18, %s87_s21 }
  0x39   : > { %p134_p13 = scmp.eq.s32.totalorder %s532_s15, 1  ;;  %p89_p0 = scmp.eq.s32.totalorder %s88_s1, 0 }
  0x3a   : > { %s1198_s0 = scalar_select %p1011_p11, 1, 0 }
  0x3b   : > { %p1018_p2 = por %p134_p13, %p133_p12  ;;  %p610_p3 = scmp.lt.s32.totalorder %s886_s13, 2 }
  0x3c   : > { %s1024_s28 = scalar_select %p89_p0, %s874_s10, %s91_s19  }
  0x3d   : > { %s1199_s27 = scalar_select %p1018_p2, 1, 0 }
  0x3e   : > { %s157_s29 = sand.u32 1, %s874_s10   ;;  %p1029_p4 = pnand %p610_p3, %p995_p6 }
  0x3f   : > { %s537_s8 = sshll.u32 %s157_s29, 7  ;;  %s1217_s17 = smov (!%p995_p6, %s533_s17), 0 }
  0x40   : > { %s594_s14 = scalar_select %p995_p6, [#allocation3], [#allocation10] }
  0x41   : > { %s1221_s17 = smov (!%p610_p3, %s1217_s17), 0  ;;  %p541_p5 = scmp.ge.s32.totalorder %s886_s13, 1 }
  0x42   : > { %s1219_s14 = smov (!%p610_p3, %s594_s14), [#allocation11]  ;;  %s161_s18 = scalar_lea.vmem [#allocation6], %s537_s8 }
  0x43   : > { %s169_s15 = sld [smem:[%s1219_s14 + %s1221_s17]]  ;;  %s176_s19 = sshll.u32 %s161_s18, 4  ;;  %s1045_s19 = int_to_ptr.vmem [resolvable:$true] %s176_s19 }
  0x44   : > { %p184_p8 = scmp.lt.s32.totalorder %s886_s13, 3  ;;  %s1052_s17 = scalar_lea.sflag [#allocation7], %s157_s29 }
  0x45   : > { %p750_p10 = pneg %p1029_p4 }
  0x46   : > { %p1041_p9 = pnand %p541_p5, %p184_p8 }
  0x49   : > { %s571_s21 = sshll.u32 %s169_s15, 11  ;;  %s753_s15 = scalar_lea.hbm %s1190_s4, 4096 }
  0x4a   : > { %s1050_s22 = scalar_lea.hbm %s1190_s4, %s571_s21 }
  0x4b   : > { %s748_s1 = scalar_lea.hbm %s1050_s22, 2048  ;;  %p754_p0 = scmp.lt.u32.totalorder %s1050_s22, %s1190_s4 }
  0x4c   : > { %p749_p6 = scmp.ne.s32.totalorder %s1050_s22, %s748_s1  ;;  %p755_p3 = scmp.lt.u32.totalorder %s753_s15, %s748_s1 }
  0x4d   : > { %p757_p8 = scmp.lt.u32.totalorder %s748_s1, %s1050_s22 }
  0x4e   : > { %p751_p12 = pnand %p750_p10, %p749_p6  ;;  %p756_p5 = por %p755_p3, %p754_p0 }
  0x50   : > { %p752_p13 = pneg %p751_p12  ;;  %p758_p1 = por %p757_p8, %p756_p5 }
  0x52   : > { %p759_p2 = pnand %p758_p1, %p752_p13 }
  0x54   : > { %762 = shalt.err (!%p759_p2)
}
  0x55   : > { %s763_s29 = scalar_lea.vmem %s1045_s19, 2048  ;;  %s891_s24 = smov [#allocation6]  }
  0x56   : > { %p764_p6 = scmp.ne.s32.totalorder %s1045_s19, %s763_s29  ;;  %s768_s25 = sshll.u32 %s891_s24, 4  ;;  %s769_s25 = int_to_ptr.vmem [resolvable:$false] %s768_s25 }
  0x57   : > { %s770_s8 = scalar_lea.vmem %s769_s25, 4096  ;;  %p771_p7 = scmp.lt.s32.totalorder %s1045_s19, %s769_s25 }
  0x58   : > { %p766_p12 = pnand %p764_p6, %p750_p10  ;;  %p772_p0 = scmp.lt.s32.totalorder %s770_s8, %s763_s29 }
  0x5a   : > { %p767_p11 = pneg %p766_p12  ;;  %p773_p3 = por %p772_p0, %p771_p7 }
  0x5c   : > { %p774_p5 = pnand %p773_p3, %p767_p11 }
  0x5e   : > { %777 = shalt.err (!%p774_p5)
}
  0x5f   : > { %s892_s1 = smov 64   ;;  %s893_s14 = smov 4  }
  0x60   : > { %605 = dma.hbm_to_vmem [thread:$0]  (!%p1029_p4), %s1050_s22, 2048, %s1045_s19, %s1052_s17, %s892_s1, %s892_s1, %s893_s14  }
  0x61   : > { %188 = sbr.rel (%p1041_p9) target bundleno = 392 (0x188), region = 28  ;;  %s190_s15 = sand.u32 (!%p1041_p9), 1, %s870_s9  }
  0x62   : > { %s542_s18 = sshll.u32 (!%p1041_p9), %s190_s15, 7  ;;  %s191_s21 = scalar_lea.sflag (!%p1041_p9), [#allocation7], %s190_s15 }
  0x63   : > { %s1083_s29 = scalar_lea.vmem (!%p1041_p9), [#allocation6], %s542_s18  ;;  %p1202_p7 = scmp.ne.s32.totalorder (!%p1041_p9), %s1197_s23, 0 }
  0x68   : > { %845 = dma.done.wait (%p1202_p7), %s191_s21, 2048  }
  0x69   : > { %847 = vsyncadd (%p1202_p7), %s191_s21, 4294965248  ;;  %s212_s30 = sand.u32 1, %s858_s2   ;;  %s230_s19 = sld [smem:[#allocation4 + %s878_s11]]  ;;  %v894_v0 = vmov 0.0  }
  0x6a   : > { %s543_s20 = sshll.u32 %s212_s30, 4 }
  0x6b   : > { %s1093_s22 = scalar_lea.vmem [#allocation9], %s543_s20 }
  0x6c   : > { %228 = vst [vmem:[%s1093_s22] sm:$0xff] %v894_v0  ;;  %229 = vst [vmem:[%s1093_s22 + $0x8] sm:$0xff] %v894_v0 }
  0x6f   : > { %p545_p11 = scmp.le.s32.totalorder %s230_s19, 0 }
  0x70   : > { %v693_v1 = vld [vmem:[%s1083_s29 + $0x40] sm:$0xff] (!%p545_p11)   ;;  %s546_s23 = sshll.u32 (!%p545_p11), %s878_s11, 7  ;;  %v695_v3 = vld [vmem:[%s1083_s29 + $0x48] sm:$0xff] (!%p545_p11)   ;;  %v697_v5 = vld [vmem:[%s1083_s29 + $0x50] sm:$0xff] (!%p545_p11)  }
  0x71   : > { %234 = sbr.rel (%p545_p11) target bundleno = 365 (0x16d), region = 40  ;;  %v694_v2 = vld [vmem:[%s1083_s29] sm:$0xff] (!%p545_p11)   ;;  %s242_s17 = sld [smem:[#allocation5 + %s546_s23]] (!%p545_p11)  ;;  %572 = vmatprep.subr.bf16.mxu0 (!%p545_p11), %v693_v1  ;;  %v696_v4 = vld [vmem:[%s1083_s29 + $0x8] sm:$0xff] (!%p545_p11)   ;;  %v698_v6 = vld [vmem:[%s1083_s29 + $0x10] sm:$0xff] (!%p545_p11)  }
  0x72   : > { %573 = vmatpush3.bf16.msra.mxu0 (!%p545_p11), %v694_v2  ;;  %v699_v7 = vld [vmem:[%s1083_s29 + $0x58] sm:$0xff] (!%p545_p11)   ;;  %v701_v9 = vld [vmem:[%s1083_s29 + $0x60] sm:$0xff] (!%p545_p11)   ;;  %v703_v11 = vld [vmem:[%s1083_s29 + $0x68] sm:$0xff] (!%p545_p11)  }
  0x73   : > { %574 = vmatprep.subr.bf16.mxu0 (!%p545_p11), %v695_v3  ;;  %v700_v8 = vld [vmem:[%s1083_s29 + $0x18] sm:$0xff] (!%p545_p11)   ;;  %v702_v10 = vld [vmem:[%s1083_s29 + $0x20] sm:$0xff] (!%p545_p11)   ;;  %v704_v13 = vld [vmem:[%s1083_s29 + $0x28] sm:$0xff] (!%p545_p11)  }
  0x74   : > { %v705_v14 = vld [vmem:[%s1083_s29 + $0x70] sm:$0xff] (!%p545_p11)   ;;  %v707_v16 = vld [vmem:[%s1083_s29 + $0x78] sm:$0xff] (!%p545_p11)  }
  0x75   : > { %v706_v15 = vld [vmem:[%s1083_s29 + $0x30] sm:$0xff] (!%p545_p11)   ;;  %v708_v17 = vld [vmem:[%s1083_s29 + $0x38] sm:$0xff] (!%p545_p11)  }
  0x76   : > { %575 = vmatpush3.bf16.msra.mxu0 (!%p545_p11), %v696_v4  ;;  %v250_v20 = vld [vmem:[%s1093_s22] sm:$0xff] (!%p545_p11)  ;;  %v251_v24 = vld [vmem:[%s1093_s22 + $0x8] sm:$0xff] (!%p545_p11) }
  0x77   : > { %s547_s24 = sshll.u32 (!%p545_p11), %s242_s17, 8  ;;  %576 = vmatprep.subr.bf16.mxu0 (!%p545_p11), %v697_v5 }
  0x78   : > { %s244_s25 = sshra.s32 %s547_s24, 7 }
  0x79   : > { %s548_s8 = sshll.u32 %s244_s25, 2 }
  0x7a   : > { %577 = vmatpush3.bf16.msra.mxu0 %v698_v6  ;;  %s247_s15 = scalar_lea.vmem %s1189_s3, %s548_s8 }
  0x7b   : > { %578 = vmatprep.subr.bf16.mxu0 %v699_v7  ;;  %v711_v12 = vld [vmem:[%s247_s15 + $0x4] ss:$8 sps:$4 sm:$0xff]   ;;  %v709_v18 = vld [vmem:[%s247_s15] ss:$8 sps:$4 sm:$0xff]  }
  0x7c   : > { %422 = vmatprep.mubr.bf16.mxu0 %v711_v12 }
  0x7e   : > { %579 = vmatpush3.bf16.msra.mxu0 %v700_v8 }
  0x7f   : > { %580 = vmatprep.subr.bf16.mxu0 %v701_v9 }
  0x82   : > { %581 = vmatpush3.bf16.msra.mxu0 %v702_v10 }
  0x83   : > { %582 = vmatprep.subr.bf16.mxu0 %v703_v11 }
  0x86   : > { %583 = vmatpush3.bf16.msra.mxu0 %v704_v13 }
  0x87   : > { %584 = vmatprep.subr.bf16.mxu0 %v705_v14 }
  0x8a   : > { %585 = vmatpush3.bf16.msra.mxu0 %v706_v15 }
  0x8b   : > { %586 = vmatprep.subr.bf16.mxu0 %v707_v16 }
  0x8e   : > { %587 = vmatpush3.bf16.msra.mxu0 %v708_v17 }
  0x91   : > { %423 = vmatmul.mubr.bf16.vlgmr.msra.gmra.mrb[0].mxu0 %v709_v18 }
 0x164   : > { %v588_v19 = vpop.f32.mrb[0].mxu0 }
 0x165   : > { %v589_v21 = vpop.f32.mrb[1].mxu0 }
 0x166   : > { %v590_v22 = vadd.f32 %v589_v21, %v588_v19  ;;  %v591_v23 = vpop.f32.mrb[2].mxu0 }
 0x167   : > { %v592_v25 = vpop.f32.mrb[3].mxu0 }
 0x168   : > { %v431_v26 = vadd.f32 %v590_v22, %v250_v20  ;;  %v593_v27 = vadd.f32 %v592_v25, %v591_v23 }
 0x16a   : > { %433 = vst [vmem:[%s1093_s22] sm:$0xff] %v431_v26  ;;  %v432_v28 = vadd.f32 %v593_v27, %v251_v24 }
 0x16c   : > { %434 = vst [vmem:[%s1093_s22 + $0x8] sm:$0xff] %v432_v28 }
 0x16d PF: > { %s568_s18 = sshll.u32 %s878_s11, 7  ;;  %s448_s20 = sshll.u32 %s1093_s22, 4  ;;  %s1128_s20 = int_to_ptr.vmem [resolvable:$true] %s448_s20 }
 0x16e   : > { %s1125_s19 = scalar_lea.hbm %s1191_s5, %s568_s18  ;;  %s1132_s23 = scalar_lea.sflag [#allocation8], %s212_s30 }
 0x16f   : > { %s778_s17 = scalar_lea.vmem %s1128_s20, 256  ;;  %p1203_p2 = scmp.ne.s32.totalorder %s1198_s0, 0 }
 0x170   : > { %p779_p1 = scmp.ne.s32.totalorder %s1128_s20, %s778_s17  ;;  %s895_s11 = smov [#allocation9]  }
 0x171   : > { %s782_s24 = sshll.u32 %s895_s11, 4  ;;  %s783_s24 = int_to_ptr.vmem [resolvable:$false] %s782_s24 }
 0x172   : > { %p780_p4 = pnand %p779_p1, %p1203_p2  ;;  %s784_s25 = scalar_lea.vmem %s783_s24, 512 }
 0x173   : > { %p785_p10 = scmp.lt.s32.totalorder %s1128_s20, %s783_s24  ;;  %p786_p13 = scmp.lt.s32.totalorder %s784_s25, %s778_s17 }
 0x174   : > { %p781_p9 = pneg %p780_p4 }
 0x175   : > { %p787_p8 = por %p786_p13, %p785_p10 }
 0x177   : > { %p788_p6 = pnand %p787_p8, %p781_p9 }
 0x179   : > { %791 = shalt.err (!%p788_p6)
}
 0x17a   : > { %s792_s30 = scalar_lea.hbm %s1125_s19, 256  ;;  %s796_s1 = scalar_lea.hbm %s1191_s5, 512 }
 0x17b   : > { %p793_p12 = scmp.ne.s32.totalorder %s1125_s19, %s792_s30  ;;  %p797_p5 = scmp.lt.u32.totalorder %s1125_s19, %s1191_s5 }
 0x17c   : > { %p798_p7 = scmp.lt.u32.totalorder %s796_s1, %s792_s30  ;;  %p800_p1 = scmp.lt.u32.totalorder %s792_s30, %s1125_s19 }
 0x17d   : > { %p794_p0 = pnand %p793_p12, %p1203_p2 }
 0x17e   : > { %p799_p11 = por %p798_p7, %p797_p5 }
 0x17f   : > { %p795_p3 = pneg %p794_p0 }
 0x180   : > { %p801_p4 = por %p800_p1, %p799_p11 }
 0x182   : > { %p802_p9 = pnand %p801_p4, %p795_p3 }
 0x184   : > { %805 = shalt.err (!%p802_p9)
}
 0x185   : > { %s896_s18 = smov 128   ;;  %s897_s21 = smov 256  }
 0x186   : > { %s898_s29 = smov 8  }
 0x187   : > { %598 = dma.vmem_to_hbm [thread:$0]  (%p1203_p2), %s1128_s20, 256, %s1125_s19, %s1132_s23, %s896_s18, %s897_s21, %s898_s29  }
 0x188 PF: > { %s463_s17 = sand.u32 1, %s854_s6   ;;  %p1204_p10 = scmp.ne.s32.totalorder %s1199_s27, 0 }
 0x189   : > { %p1205_p13 = scmp.ge.s32.totalorder %s886_s13, 2  ;;  %s464_s11 = scalar_lea.sflag [#allocation8], %s463_s17 }
 0x18b   : > { %p607_p8 = pnand %p1205_p13, %p1204_p10 }
 0x18d   : > { %849 = dma.done.wait (!%p607_p8), %s464_s11, 256  }
 0x18e   : > { %851 = vsyncadd (!%p607_p8), %s464_s11, 4294967040  ;;  %s35_s13 = sadd.s32 1, %s886_s13   ;;  %s1206_s6 = smov %s858_s2 }
 0x18f   : > { %p32_p6 = scmp.ge.s32.totalorder %s35_s13, 4   ;;  %s1207_s2 = smov %s862_s7 }
 0x190   : > { %s1208_s7 = smov %s1009_s26  ;;  %s1209_s8 = smov %s870_s9 }
 0x191   : > { %s1210_s9 = smov %s874_s10  ;;  %s1211_s10 = smov %s1024_s28 }
 0x192   : > { %s1212_s11 = smov %s882_s12  ;;  %s1213_s12 = smov %s1215_s16 }
 0x193   :  { %34 = sbr.rel (!%p32_p6) target bundleno = 43 (0x2b), region = 82 }
 0x19a   :  { %469 = vsyncpa [#allocation7], 1 }
 0x19b   :  { %471 = vsyncpa [#allocation7 + $0x1], 1 }
 0x19c   :  { %472 = vsyncpa [#allocation8], 1 }
 0x19d   :  { %474 = vsyncpa [#allocation8 + $0x1], 1 }

</bundles_post_ra>
